<compile_context>
chip_gen: v5e
topology: v5e:2x2
jax: 0.10.0
libtpu: 0.0.40
codegen_flags: <defaults>
</compile_context>

<pallas_src>
import math
from functools import partial

import jax
import jax.numpy as jnp
import numpy as np
from jax.experimental import pallas as pl
from jax.experimental.pallas import tpu as pltpu

KSIZE = 3
STRIDE = 1
RATE = 2
SOFTMAX_SCALE = 10.0
MAX_TQ = 512          # max query rows resident per grid step


# ----------------------------- plain-JAX glue --------------------------------
def _same_pad_amounts(H, W, k, s):
    out_h = -(-H // s)
    out_w = -(-W // s)
    pad_h = max(0, (out_h - 1) * s + k - H)
    pad_w = max(0, (out_w - 1) * s + k - W)
    top = pad_h // 2
    left = pad_w // 2
    return top, pad_h - top, left, pad_w - left


def extract_image_patches(x, k, s):
    """x: [N, C, H, W] -> [N, L, C*k*k]  (feature order c, kh, kw; L row-major).
    Mirrors same_padding (zero pad) + nn.Unfold.  Loops only over the k*k kernel
    offsets (not over every output position) to keep trace / compile size small."""
    N, C, H, W = x.shape
    t, b, l, r = _same_pad_amounts(H, W, k, s)
    xp = jnp.pad(x, ((0, 0), (0, 0), (t, b), (l, r)))
    Hp, Wp = H + t + b, W + l + r
    oh = (Hp - k) // s + 1
    ow = (Wp - k) // s + 1
    feats = []
    for dh in range(k):
        for dw in range(k):
            win = xp[:, :, dh:dh + (oh - 1) * s + 1:s, dw:dw + (ow - 1) * s + 1:s]
            feats.append(win)                                    # [N, C, oh, ow]
    p = jnp.stack(feats, axis=2).reshape(N, C, k, k, oh, ow)
    p = p.transpose(0, 4, 5, 1, 2, 3).reshape(N, oh * ow, C * k * k)
    return p


def cos_function_weight(width):
    # TODO(synk): original `cos_function_weight` helper source not provided;
    # using a deterministic cosine ramp (1.0 at left edge -> 0.0 at right edge).
    idx = np.arange(width, dtype=np.float32)
    return np.cos(idx / max(width - 1, 1) * (math.pi / 2.0)).astype(np.float32)


# ------------------------------ Pallas kernel --------------------------------
def _ca_kernel(x_ref, p_ref, wl_ref, wr_ref, bl_ref, br_ref, out_ref, *, L):
    # stacked similarity matmul (left | right patches), bf16 MXU / f32 accumulate.
    # Patches arrive pre-L2-normalised and pre-scaled by softmax_scale.
    s = jnp.dot(x_ref[0], p_ref[0], preferred_element_type=jnp.float32)   # [tq, 2L]

    def _softmax(z):                                             # over the patch axis
        m = jnp.max(z, axis=1, keepdims=True)
        e = jnp.exp(z - m)
        return (e * pl.reciprocal(jnp.sum(e, axis=1, keepdims=True),
                                  approx=True)).astype(jnp.bfloat16)

    a_l = _softmax(s[:, :L])                                     # [tq, L]
    a_r = _softmax(s[:, L:])

    # one wide reconstruction matmul per branch; columns = (kh, kw, level, c).
    t_l = jnp.dot(a_l, wl_ref[0], preferred_element_type=jnp.float32)     # [tq, KK*CT]
    t_r = jnp.dot(a_r, wr_ref[0], preferred_element_type=jnp.float32)

    # cosine left/right blend (the conv_transpose "/4.0" is folded into bl/br).
    out_ref[0] = bl_ref[...] * t_l + br_ref[...] * t_r


# ------------------------------ module wrapper --------------------------------
def prepare(left, right, mid, shortcut_l, shortcut_r,
            ksize=KSIZE, stride=STRIDE, rate=RATE, softmax_scale=SOFTMAX_SCALE):
    N, C_raw, Hr, Wr = shortcut_l[0].shape
    C_feat = mid.shape[1]
    nlev = len(shortcut_l)
    kernel = 2 * rate

    # F.interpolate(..., scale_factor=1/rate, mode='nearest')
    left_d = left[:, :, ::rate, ::rate]
    right_d = right[:, :, ::rate, ::rate]
    mid_d = mid[:, :, ::rate, ::rate]
    Hm, Wm = mid_d.shape[2], mid_d.shape[3]

    lp = extract_image_patches(left_d, ksize, stride)            # [N, L, CK]
    rp = extract_image_patches(right_d, ksize, stride)
    xw = extract_image_patches(mid_d, ksize, 1)                   # [N, HW, CK]
    L = lp.shape[1]
    CK = C_feat * ksize * ksize
    HW = xw.shape[1]

    # stacked + pre-transposed background patches [N, CK, 2L] (left | right),
    # per-patch L2 normalisation (escape_NaN adds 1e-4 per squared element) and
    # softmax scale folded in; stored bf16 (feeds the MXU directly).
    pats = jnp.concatenate([lp, rp], axis=1).transpose(0, 2, 1).astype(jnp.float32)
    ssq = jnp.sum(pats * pats, axis=1, keepdims=True) + CK * 1e-4           # [N,1,2L]
    pats = (pats * jax.lax.rsqrt(ssq) * softmax_scale).astype(jnp.bfloat16)

    # raw (2*rate x 2*rate) shortcut patches as one wide reconstruction weight
    # [N, L, KK*CT], column order (kh, kw, level, c).  Stored bf16.
    KK = kernel * kernel
    CT = nlev * C_raw
    KKCT = KK * CT

    def raw_weight(levels):
        per = []
        for t in levels:
            r = extract_image_patches(t, kernel, rate * stride)  # [N, L, C_raw*KK]
            r = r.reshape(N, L, C_raw, kernel, kernel)
            per.append(r.transpose(0, 1, 3, 4, 2))                # [N, L, kh, kw, C]
        w = jnp.stack(per, axis=4)                                # [N, L, kh, kw, lvl, C]
        return w.reshape(N, L, KKCT).astype(jnp.bfloat16)

    wl = raw_weight(shortcut_l)
    wr = raw_weight(shortcut_r)

    # Blend masks for the pre-fold slab [HW, KK*CT]:
    #   B_l[(h,w), (kh,kw,ct)] = wcos[rate*w + kw - 1]  (the output column of that
    #   contribution); out-of-range columns are clipped (dropped by the fold anyway).
    # The conv_transpose2d "/4.0" is folded in here.
    wcos = cos_function_weight(Wr)
    w_idx = np.arange(HW, dtype=np.int64) % Wm
    kw_idx = (np.arange(KKCT, dtype=np.int64) // CT) % kernel
    ow = np.clip(rate * w_idx[:, None] + kw_idx[None, :] - 1, 0, Wr - 1)
    b_l = jnp.asarray(wcos[ow] * 0.25, dtype=jnp.float32)         # [HW, KKCT]
    b_r = jnp.asarray(wcos[::-1][ow] * 0.25, dtype=jnp.float32)   # weight.flip(3)

    dims = dict(N=N, C_raw=C_raw, C_feat=C_feat, nlev=nlev, Hm=Hm, Wm=Wm,
                Hr=Hr, Wr=Wr, L=L, CK=CK, HW=HW, KK=KK, CT=CT, KKCT=KKCT,
                kernel=kernel, rate=rate)
    return dict(xw=xw.astype(jnp.bfloat16), pats=pats, wl=wl, wr=wr,
                b_l=b_l, b_r=b_r, dims=dims)


def _choose_tq(HW):
    """Query-row tile: full HW when small, otherwise the largest divisor of HW
    that is a multiple of 16 and <= MAX_TQ (bounds per-step VMEM footprint)."""
    if HW <= MAX_TQ:
        return HW
    for t in range(MAX_TQ, 15, -16):
        if HW % t == 0:
            return t
    return HW


def run_pallas(prep):
    d = prep["dims"]
    N, L, CK, HW, KKCT = d["N"], d["L"], d["CK"], d["HW"], d["KKCT"]
    tq = _choose_tq(HW)
    nq = HW // tq
    kern = partial(_ca_kernel, L=L)
    # TODO(synk): for extremely large L the resident [L, KK*CT] reconstruction
    # weights would also need tiling (online-softmax style); unnecessary here.
    return pl.pallas_call(
        kern,
        out_shape=jax.ShapeDtypeStruct((N, HW, KKCT), jnp.float32),
        grid_spec=pltpu.PrefetchScalarGridSpec(
            num_scalar_prefetch=0,
            grid=(N, nq),
            in_specs=[
                pl.BlockSpec((1, tq, CK), lambda b, q: (b, q, 0)),
                pl.BlockSpec((1, CK, 2 * L), lambda b, q: (b, 0, 0)),
                pl.BlockSpec((1, L, KKCT), lambda b, q: (b, 0, 0)),
                pl.BlockSpec((1, L, KKCT), lambda b, q: (b, 0, 0)),
                pl.BlockSpec((tq, KKCT), lambda b, q: (q, 0)),
                pl.BlockSpec((tq, KKCT), lambda b, q: (q, 0)),
            ],
            out_specs=pl.BlockSpec((1, tq, KKCT), lambda b, q: (b, q, 0)),
        ),
        compiler_params=pltpu.CompilerParams(
            dimension_semantics=("parallel", "parallel")),
    )(prep["xw"], prep["pats"], prep["wl"], prep["wr"], prep["b_l"], prep["b_r"])


def fold_patch_slab(slab, dims):
    """[N, HW, KK*CT] -> [N, Hr, Wr, CT]: the conv_transpose2d(stride=rate, padding=1)
    output scatter, done as kernel*kernel static strided adds (no dense fold matrix)."""
    N, Hm, Wm, CT = dims["N"], dims["Hm"], dims["Wm"], dims["CT"]
    Hr, Wr, kernel, rate = dims["Hr"], dims["Wr"], dims["kernel"], dims["rate"]
    pad = 1
    t6 = slab.reshape(N, Hm, Wm, kernel, kernel, CT)
    Hc = rate * (Hm - 1) + kernel
    Wc = rate * (Wm - 1) + kernel
    canvas = jnp.zeros((N, Hc, Wc, CT), jnp.float32)
    for kh in range(kernel):
        for kw in range(kernel):
            canvas = canvas.at[:, kh:kh + rate * (Hm - 1) + 1:rate,
                               kw:kw + rate * (Wm - 1) + 1:rate, :].add(
                                   t6[:, :, :, kh, kw, :])
    return canvas[:, pad:pad + Hr, pad:pad + Wr, :]


def contextual_attention(left, right, mid, shortcut,
                         ksize=KSIZE, stride=STRIDE, rate=RATE,
                         softmax_scale=SOFTMAX_SCALE):
    """Full forward (two_input=True, fuse=False). Returns list of [N, C_raw, Hr, Wr]."""
    # TODO(synk): fuse=True (fuse-conv refinement) and two_input=False paths not implemented.
    prep = prepare(left, right, mid, shortcut[0], shortcut[1],
                   ksize, stride, rate, softmax_scale)
    d = prep["dims"]
    slab = run_pallas(prep)                                       # [N, HW, KK*CT]
    y = fold_patch_slab(slab, d)                                  # [N, Hr, Wr, CT]
    y = y.reshape(d["N"], d["Hr"], d["Wr"], d["nlev"], d["C_raw"])
    y = y.transpose(0, 3, 4, 1, 2)                                # [N, nlev, C_raw, Hr, Wr]
    return [y[:, i] for i in range(d["nlev"])]


def run_reference(prep):
    """Pure-JAX mirror of the in-kernel math (same bf16 matmul-input operands) used
    to validate the Pallas kernel's pre-fold output slab."""
    L = prep["dims"]["L"]
    s = jnp.einsum('nqc,ncl->nql', prep["xw"], prep["pats"],
                   preferred_element_type=jnp.float32)
    a_l = jax.nn.softmax(s[:, :, :L], axis=-1).astype(jnp.bfloat16)
    a_r = jax.nn.softmax(s[:, :, L:], axis=-1).astype(jnp.bfloat16)
    t_l = jnp.einsum('nql,nlk->nqk', a_l, prep["wl"],
                     preferred_element_type=jnp.float32)
    t_r = jnp.einsum('nql,nlk->nqk', a_r, prep["wr"],
                     preferred_element_type=jnp.float32)
    return prep["b_l"][None] * t_l + prep["b_r"][None] * t_r


# ----------------------------------- main -------------------------------------
if __name__ == "__main__":
    key = jax.random.PRNGKey(0)
    N, C_feat, C_raw, Hraw, nlev = 2, 4, 4, 16, 2
    ks = jax.random.split(key, 3 + 2 * nlev)
    left = jax.random.normal(ks[0], (N, C_feat, Hraw, Hraw), jnp.float32)
    right = jax.random.normal(ks[1], (N, C_feat, Hraw, Hraw), jnp.float32)
    mid = jax.random.normal(ks[2], (N, C_feat, Hraw, Hraw), jnp.float32)
    shortcut_l = [jax.random.normal(ks[3 + i], (N, C_raw, Hraw, Hraw), jnp.float32)
                  for i in range(nlev)]
    shortcut_r = [jax.random.normal(ks[3 + nlev + i], (N, C_raw, Hraw, Hraw), jnp.float32)
                  for i in range(nlev)]

    # Full module forward through the Pallas kernel.
    y_levels = contextual_attention(left, right, mid, [shortcut_l, shortcut_r])
    y_levels = [jax.block_until_ready(t) for t in y_levels]
    assert len(y_levels) == nlev
    assert y_levels[0].shape == (N, C_raw, Hraw, Hraw)
    assert all(bool(jnp.all(jnp.isfinite(t))) for t in y_levels)

    # Cross-check the kernel output against a pure-JAX reference that uses the
    # same bf16 matmul operands (remaining diff: EUP approx reciprocal in the
    # softmax denominator + accumulation order), hence the modest tolerance.
    prep = prepare(left, right, mid, shortcut_l, shortcut_r)
    out_pallas = jax.block_until_ready(run_pallas(prep))
    out_ref = jax.block_until_ready(run_reference(prep))
    np.testing.assert_allclose(np.asarray(out_pallas), np.asarray(out_ref),
                               rtol=1e-2, atol=1e-2)

    print("KERNEL_OK")
</pallas_src>

<mosaic_0001>
module attributes {stable_mosaic.version = 11 : i64} {
  func.func @_ca_kernel(%arg0: i32, %arg1: i32, %arg2: memref<1x64x36xbf16, #tpu.memory_space<vmem>>, %arg3: memref<1x36x128xbf16, #tpu.memory_space<vmem>>, %arg4: memref<1x64x128xbf16, #tpu.memory_space<vmem>>, %arg5: memref<1x64x128xbf16, #tpu.memory_space<vmem>>, %arg6: memref<64x128xf32, #tpu.memory_space<vmem>>, %arg7: memref<64x128xf32, #tpu.memory_space<vmem>>, %arg8: memref<1x64x128xf32, #tpu.memory_space<vmem>>) attributes {dimension_semantics = [#tpu.dimension_semantics<parallel>, #tpu.dimension_semantics<parallel>], iteration_bounds = array<i64: 2, 1>, scalar_prefetch = 0 : i64, scratch_operands = 0 : i64, tpu.core_type = #tpu.core_type<tc>, window_params = [{transform_indices = @transform_0, window_bounds = array<i64: 1, 64, 36>}, {transform_indices = @transform_1, window_bounds = array<i64: 1, 36, 128>}, {transform_indices = @transform_2, window_bounds = array<i64: 1, 64, 128>}, {transform_indices = @transform_3, window_bounds = array<i64: 1, 64, 128>}, {transform_indices = @transform_4, window_bounds = array<i64: 64, 128>}, {transform_indices = @transform_5, window_bounds = array<i64: 64, 128>}, {transform_indices = @transform_6, window_bounds = array<i64: 1, 64, 128>}]} {
    %c0 = arith.constant 0 : index
    %c0_0 = arith.constant 0 : index
    %c0_1 = arith.constant 0 : index
    %0 = vector.load %arg2[%c0, %c0_0, %c0_1] : memref<1x64x36xbf16, #tpu.memory_space<vmem>>, vector<1x64x36xbf16>
    %1 = vector.shape_cast %0 : vector<1x64x36xbf16> to vector<64x36xbf16>
    %c0_2 = arith.constant 0 : index
    %c0_3 = arith.constant 0 : index
    %c0_4 = arith.constant 0 : index
    %2 = vector.load %arg3[%c0_2, %c0_3, %c0_4] : memref<1x36x128xbf16, #tpu.memory_space<vmem>>, vector<1x36x128xbf16>
    %3 = vector.shape_cast %2 : vector<1x36x128xbf16> to vector<36x128xbf16>
    %cst = arith.constant dense<0.000000e+00> : vector<64x128xf32>
    %4 = tpu.matmul %1, %3, %cst {dimension_numbers = #tpu.dot_dimension_numbers<[1], [0], [0], [1], [0, 0, 1, 1], [], []>} : vector<64x36xbf16>, vector<36x128xbf16>, vector<64x128xf32> -> vector<64x128xf32>
    %5 = vector.extract_strided_slice %4 {offsets = [0, 0], sizes = [64, 64], strides = [1, 1]} : vector<64x128xf32> to vector<64x64xf32>
    %cst_5 = arith.constant dense<0xFF800000> : vector<64xf32>
    %6 = vector.multi_reduction <maximumf>, %5, %cst_5 [1] : vector<64x64xf32> to vector<64xf32>
    %7 = vector.shape_cast %6 : vector<64xf32> to vector<64x1xf32>
    %8 = vector.broadcast %7 : vector<64x1xf32> to vector<64x64xf32>
    %9 = arith.subf %5, %8 : vector<64x64xf32>
    %10 = math.exp %9 : vector<64x64xf32>
    %cst_6 = arith.constant dense<0.000000e+00> : vector<64xf32>
    %11 = vector.multi_reduction <add>, %10, %cst_6 [1] : vector<64x64xf32> to vector<64xf32>
    %12 = vector.shape_cast %11 : vector<64xf32> to vector<64x1xf32>
    %13 = tpu.reciprocal %12 {approx = true} : vector<64x1xf32> -> vector<64x1xf32>
    %14 = vector.broadcast %13 : vector<64x1xf32> to vector<64x64xf32>
    %15 = arith.mulf %10, %14 : vector<64x64xf32>
    %16 = arith.truncf %15 : vector<64x64xf32> to vector<64x64xbf16>
    %17 = vector.extract_strided_slice %4 {offsets = [0, 64], sizes = [64, 64], strides = [1, 1]} : vector<64x128xf32> to vector<64x64xf32>
    %cst_7 = arith.constant dense<0xFF800000> : vector<64xf32>
    %18 = vector.multi_reduction <maximumf>, %17, %cst_7 [1] : vector<64x64xf32> to vector<64xf32>
    %19 = vector.shape_cast %18 : vector<64xf32> to vector<64x1xf32>
    %20 = vector.broadcast %19 : vector<64x1xf32> to vector<64x64xf32>
    %21 = arith.subf %17, %20 : vector<64x64xf32>
    %22 = math.exp %21 : vector<64x64xf32>
    %cst_8 = arith.constant dense<0.000000e+00> : vector<64xf32>
    %23 = vector.multi_reduction <add>, %22, %cst_8 [1] : vector<64x64xf32> to vector<64xf32>
    %24 = vector.shape_cast %23 : vector<64xf32> to vector<64x1xf32>
    %25 = tpu.reciprocal %24 {approx = true} : vector<64x1xf32> -> vector<64x1xf32>
    %26 = vector.broadcast %25 : vector<64x1xf32> to vector<64x64xf32>
    %27 = arith.mulf %22, %26 : vector<64x64xf32>
    %28 = arith.truncf %27 : vector<64x64xf32> to vector<64x64xbf16>
    %c0_9 = arith.constant 0 : index
    %c0_10 = arith.constant 0 : index
    %c0_11 = arith.constant 0 : index
    %29 = vector.load %arg4[%c0_9, %c0_10, %c0_11] : memref<1x64x128xbf16, #tpu.memory_space<vmem>>, vector<1x64x128xbf16>
    %30 = vector.shape_cast %29 : vector<1x64x128xbf16> to vector<64x128xbf16>
    %cst_12 = arith.constant dense<0.000000e+00> : vector<64x128xf32>
    %31 = tpu.matmul %16, %30, %cst_12 {dimension_numbers = #tpu.dot_dimension_numbers<[1], [0], [0], [1], [0, 0, 1, 1], [], []>} : vector<64x64xbf16>, vector<64x128xbf16>, vector<64x128xf32> -> vector<64x128xf32>
    %c0_13 = arith.constant 0 : index
    %c0_14 = arith.constant 0 : index
    %c0_15 = arith.constant 0 : index
    %32 = vector.load %arg5[%c0_13, %c0_14, %c0_15] : memref<1x64x128xbf16, #tpu.memory_space<vmem>>, vector<1x64x128xbf16>
    %33 = vector.shape_cast %32 : vector<1x64x128xbf16> to vector<64x128xbf16>
    %cst_16 = arith.constant dense<0.000000e+00> : vector<64x128xf32>
    %34 = tpu.matmul %28, %33, %cst_16 {dimension_numbers = #tpu.dot_dimension_numbers<[1], [0], [0], [1], [0, 0, 1, 1], [], []>} : vector<64x64xbf16>, vector<64x128xbf16>, vector<64x128xf32> -> vector<64x128xf32>
    %c0_17 = arith.constant 0 : index
    %c0_18 = arith.constant 0 : index
    %35 = vector.load %arg6[%c0_17, %c0_18] : memref<64x128xf32, #tpu.memory_space<vmem>>, vector<64x128xf32>
    %36 = arith.mulf %35, %31 : vector<64x128xf32>
    %c0_19 = arith.constant 0 : index
    %c0_20 = arith.constant 0 : index
    %37 = vector.load %arg7[%c0_19, %c0_20] : memref<64x128xf32, #tpu.memory_space<vmem>>, vector<64x128xf32>
    %38 = arith.mulf %37, %34 : vector<64x128xf32>
    %39 = arith.addf %36, %38 : vector<64x128xf32>
    %c0_21 = arith.constant 0 : index
    %c0_22 = arith.constant 0 : index
    %c0_23 = arith.constant 0 : index
    %40 = vector.load %arg8[%c0_21, %c0_22, %c0_23] : memref<1x64x128xf32, #tpu.memory_space<vmem>>, vector<1x64x128xf32>
    %41 = vector.shape_cast %40 : vector<1x64x128xf32> to vector<64x128xf32>
    %42 = vector.shape_cast %39 : vector<64x128xf32> to vector<1x64x128xf32>
    tpu.vector_store %arg8[%c0_21, %c0_22, %c0_23], %42 {strides = array<i32>} : memref<1x64x128xf32, #tpu.memory_space<vmem>>, vector<1x64x128xf32>,
    return
  }
  func.func @transform_0(%arg0: i32, %arg1: i32) -> (i32, i32, i32) {
    %c0_i32 = arith.constant 0 : i32
    %c0_i32_0 = arith.constant 0 : i32
    return %arg0, %arg1, %c0_i32 : i32, i32, i32
  }
  func.func @transform_1(%arg0: i32, %arg1: i32) -> (i32, i32, i32) {
    %c0_i32 = arith.constant 0 : i32
    %c0_i32_0 = arith.constant 0 : i32
    %c0_i32_1 = arith.constant 0 : i32
    return %arg0, %c0_i32, %c0_i32_0 : i32, i32, i32
  }
  func.func @transform_2(%arg0: i32, %arg1: i32) -> (i32, i32, i32) {
    %c0_i32 = arith.constant 0 : i32
    %c0_i32_0 = arith.constant 0 : i32
    %c0_i32_1 = arith.constant 0 : i32
    return %arg0, %c0_i32, %c0_i32_0 : i32, i32, i32
  }
  func.func @transform_3(%arg0: i32, %arg1: i32) -> (i32, i32, i32) {
    %c0_i32 = arith.constant 0 : i32
    %c0_i32_0 = arith.constant 0 : i32
    %c0_i32_1 = arith.constant 0 : i32
    return %arg0, %c0_i32, %c0_i32_0 : i32, i32, i32
  }
  func.func @transform_4(%arg0: i32, %arg1: i32) -> (i32, i32) {
    %c0_i32 = arith.constant 0 : i32
    %c0_i32_0 = arith.constant 0 : i32
    return %arg1, %c0_i32 : i32, i32
  }
  func.func @transform_5(%arg0: i32, %arg1: i32) -> (i32, i32) {
    %c0_i32 = arith.constant 0 : i32
    %c0_i32_0 = arith.constant 0 : i32
    return %arg1, %c0_i32 : i32, i32
  }
  func.func @transform_6(%arg0: i32, %arg1: i32) -> (i32, i32, i32) {
    %c0_i32 = arith.constant 0 : i32
    %c0_i32_0 = arith.constant 0 : i32
    return %arg0, %arg1, %c0_i32 : i32, i32, i32
  }
}

</mosaic_0001>

<bundles_post_ra>
// kernel: tpu_custom_call.1
= control target key start
LH: loop header
LB: loop body
LE: loop exit
PB: predicated region body
PF: predicated region fallthrough
CT: control target
= control target key end

     0   :  { %11 = vsyncpa [#allocation3], 0  ;;  %s1846_s0 = inlined_call_operand.vmem [shape: bf16[2,64,36], index: 0, kind: input, shape index: {}]   ;;  %s1847_s1 = inlined_call_operand.vmem [shape: bf16[2,36,128], index: 1, kind: input, shape index: {}]   ;;  %s1848_s2 = inlined_call_operand.vmem [shape: bf16[2,64,128], index: 2, kind: input, shape index: {}]   ;;  %s1849_s3 = inlined_call_operand.vmem [shape: bf16[2,64,128], index: 3, kind: input, shape index: {}]   ;;  %s1850_s4 = inlined_call_operand.hbm [shape: f32[64,128], index: 4, kind: input, shape index: {}]   ;;  %s1851_s5 = inlined_call_operand.hbm [shape: f32[64,128], index: 5, kind: input, shape index: {}]   ;;  %s1852_s6 = inlined_call_operand.hbm [shape: f32[2,64,128], index: 6, kind: output, shape index: {}]  }
   0x1   :  { %12 = vsyncpa [#allocation6], 0 }
   0x2   :  { %13 = vsyncpa [#allocation4], 0 }
   0x3   :  { %15 = vsyncpa [#allocation4 + $0x1], 0  ;;  %s1523_s21 = smov 0   ;;  %s1525_s22 = smov 0  }
   0x4   :  { %s1527_s23 = smov 0   ;;  %s1529_s24 = smov 0  }
   0x5   :  { %s1531_s25 = smov 0   ;;  %s1533_s26 = smov 0  }
   0x6 LB: > { %s1071_s27 = sadd.s32 4294967295, %s1479_s26   ;;  %s1072_s28 = sadd.s32 4294967294, %s1479_s26   ;;  %s1479_s26 = sphi %s1533_s26, %s21_s26   ;;  %s1475_s25 = sphi %s1531_s25, %s1861_s25   ;;  %s1471_s24 = sphi %s1529_s24, %s1860_s24   ;;  %s1467_s23 = sphi %s1527_s23, %s1859_s23   ;;  %s1463_s22 = sphi %s1525_s22, %s1858_s22   ;;  %s1459_s21 = sphi %s1523_s21, %s1857_s21  }
   0x7   : > { %s33_s29 = sadd.s32 1, %s1475_s25  ;;  %s200_s30 = sadd.s32 1, %s1467_s23 }
   0x8   : > { %p35_p0 = scmp.ge.s32.totalorder %s33_s29, 2  ;;  %p210_p1 = scmp.ne.s32.totalorder %s1467_s23, %s1463_s22 }
   0x9   : > { %p211_p2 = scmp.eq.s32.totalorder %s1071_s27, 1  ;;  %p216_p3 = scmp.ne.s32.totalorder %s1463_s22, %s1459_s21 }
   0xa   : > { %s1863_s29 = smov (%p35_p0, %s33_s29), 0  ;;  %p217_p5 = scmp.eq.s32.totalorder %s1072_s28, 1 }
   0xb   : > { %p1563_p4 = por %p211_p2, %p210_p1  ;;  %s195_s8 = ssub.s32 %s1475_s25, %s1863_s29 }
   0xc   : > { %p1073_p6 = scmp.ge.s32.totalorder %s1479_s26, 1  ;;  %p198_p7 = scmp.eq.s32.totalorder %s195_s8, 0 }
   0xd   : > { %p1570_p8 = por %p217_p5, %p216_p3  ;;  %p224_p9 = scmp.lt.s32.totalorder %s1479_s26, 3 }
   0xe   : > { %s1576_s10 = scalar_select %p198_p7, %s1467_s23, %s200_s30  }
   0xf   : > { %p1578_p10 = pnand %p1073_p6, %p224_p9  ;;  %p1582_p11 = scmp.eq.s32.totalorder %s1071_s27, 0 }
  0x10   : > { %s238_s15 = sshll.u32 %s1850_s4, 4  ;;  %s1481_s16 = smov [#allocation2]   ;;  %s239_s15 = int_to_ptr.hbm [resolvable:$true] %s238_s15 }
  0x11   : > { %p1198_p12 = pneg %p1578_p10  ;;  %s240_s17 = sshll.u32 %s1481_s16, 4  ;;  %s241_s17 = int_to_ptr.vmem [resolvable:$true] %s240_s17 }
  0x12   : > { %s255_s20 = sshll.u32 %s1851_s5, 4  ;;  %s1482_s27 = smov 128   ;;  %s256_s20 = int_to_ptr.hbm [resolvable:$true] %s255_s20 }
  0x13   : > { %p1199_p13 = pnand %p1582_p11, %p1198_p12  ;;  %s1483_s28 = smov 8  }
  0x14   : > { %s1484_s30 = smov [#allocation5]   ;;  %310 = sbr.rel (%p1578_p10) target bundleno = 897 (0x381), region = 44 }
  0x15   : > { %1201 = dma.hbm_to_vmem [thread:$0]  (!%p1199_p13), %s239_s15, 1024, %s241_s17, [#allocation3], %s1482_s27, %s1482_s27, %s1483_s28  }
  0x16   : > { %s257_s8 = sshll.u32 %s1484_s30, 4  ;;  %s258_s8 = int_to_ptr.vmem [resolvable:$true] %s257_s8 }
  0x17   : > { %1204 = dma.hbm_to_vmem [thread:$0]  (!%p1199_p13), %s256_s20, 1024, %s258_s8, [#allocation6], %s1482_s27, %s1482_s27, %s1483_s28  }
  0x19   : > { %1446 = dma.done.wait (%p1582_p11), [#allocation3], 1024  }
  0x1a   : > { %1448 = vsyncadd (%p1582_p11), [#allocation3], 4294966272 }
  0x1b   : > { %1450 = dma.done.wait (%p1582_p11), [#allocation6], 1024  }
  0x1c   : > { %1452 = vsyncadd (%p1582_p11), [#allocation6], 4294966272  ;;  %p366_p0 = scmp.lt.s32.totalorder %s1471_s24, 1  ;;  %vm455_vm0 = vcmask 1041408   ;;  %vm442_vm1 = vcmask 293888   ;;  %vm581_vm2 = vcmask 1048064  }
  0x1d   : > { %vm488_vm3 = vcmask 523264   ;;  %s1485_s20 = smov 64   ;;  %s362_s15 = sand.u32 1, %s1463_s22  }
  0x1e   : > { %s367_s13 = scalar_select %p366_p0, %s1471_s24, 1 }
  0x1f   : > { %s1080_s11 = sshll.u32 %s362_s15, 6 }
  0x20   : > { %s1187_s14 = smul.u32 20, %s367_s13  ;;  %s1611_s17 = sshll.u32 %s367_s13, 5 }
  0x21   : > { %s373_s19 = scalar_lea.vmem %s1846_s0, %s1611_s17  ;;  %s384_s30 = scalar_lea.vmem %s1848_s2, %s1611_s17 }
  0x22   : > { %s379_s16 = scalar_lea.vmem %s1847_s1, %s1187_s14  ;;  %v1164_v6 = vld [vmem:[%s373_s19] sm:$0xff]  ;;  %v1165_v7 = vld [vmem:[%s373_s19 + $0x8] sm:$0xff]  ;;  %v1166_v8 = vld [vmem:[%s373_s19 + $0x10] sm:$0xff]  ;;  %s389_s14 = scalar_lea.vmem %s1849_s3, %s1611_s17 }
  0x23   : > { %v406_v0 = vld [vmem:[%s379_s16 + $0x10] sm:$0x3]  ;;  %v1169_v4 = vld [vmem:[%s379_s16 + $0x8] sm:$0xff]  ;;  %v1168_v5 = vld [vmem:[%s379_s16] sm:$0xff]  ;;  %s1797_s16 = scalar_lea.vmem [#allocation7], %s1080_s11  ;;  %s1178_s17 = sshll.u32 %s1471_s24, 6 }
  0x24   : > { %v436_v1 = vunpack.c.l.b16 %v406_v0  ;;  %v1167_v9 = vld [vmem:[%s373_s19 + $0x18] sm:$0xff]  ;;  %s926_s19 = scalar_lea.hbm %s1852_s6, %s1178_s17  ;;  %s913_s24 = scalar_lea.sflag [#allocation4], %s362_s15 }
  0x25   : > { %s929_s27 = sshll.u32 %s926_s19, 4  ;;  %s930_s27 = int_to_ptr.hbm [resolvable:$true] %s929_s27 }
  0x26   : > { %v439_v2 = vpack.c.b16 %v436_v1, %v436_v1  ;;  %s1407_s28 = sshra.s32 %s930_s27, 4  ;;  %s1408_s28 = int_to_ptr.hbm [resolvable:$true] %s1407_s28 }
  0x27   : > { %p1414_p5 = scmp.lt.s32.totalorder %s1408_s28, %s1852_s6 }
  0x28   : > { %v457_v3 = vsel %vm455_vm0, %v439_v2, 0 }
  0x29   : > { %464 = vmatpush.bf16.msra.mxu0 %v457_v3 }
  0x2d   : > { %465 = vmatpush.bf16.msra.mxu0 %v1169_v4 }
  0x31   : > { %466 = vmatpush.bf16.msra.mxu0 %v1168_v5 }
  0x34   : > { %1112 = vmatmul.msk.bf16.vlgmr.msra.gmra.mxu0 %vm442_vm1, %v1164_v6 }
  0x44   : > { %1113 = vmatmul.msk.bf16.gmra.mxu0 %vm442_vm1, %v1165_v7 }
  0x54   : > { %1114 = vmatmul.msk.bf16.gmra.mxu0 %vm442_vm1, %v1166_v8 }
  0x64   : > { %1115 = vmatmul.msk.bf16.gmra.mxu0 %vm442_vm1, %v1167_v9 }
  0xb1   : > { %v1617_v10 = vpop.f32.mrf.mxu0 }
  0xb2   : > { %v582_v11 = vsel %vm581_vm2, %v1617_v10, -inf  ;;  %v489_v12 = vsel %vm488_vm3, %v1617_v10, -inf }
  0xb3   : > { %583 = vmax.xlane.f32.xlu0 %v582_v11  ;;  %490 = vmax.xlane.f32.xlu2 %v489_v12 }
  0xb9   : > { %v1623_v13 = vpop.f32.mrf.mxu0 }
  0xba   : > { %v585_v14 = vsel %vm581_vm2, %v1623_v13, -inf  ;;  %v492_v3 = vsel %vm488_vm3, %v1623_v13, -inf }
  0xbb   : > { %586 = vmax.xlane.f32.xlu1 %v585_v14 }
  0xc1   : > { %v1627_v15 = vpop.f32.mrf.mxu0 }
  0xc2   : > { %v588_v16 = vsel %vm581_vm2, %v1627_v15, -inf  ;;  %v495_v18 = vsel %vm488_vm3, %v1627_v15, -inf }
  0xc3   : > { %589 = vmax.xlane.f32.xlu0 %v588_v16 }
  0xc9   : > { %v1631_v17 = vpop.f32.mrf.mxu0 }
  0xca   : > { %v498_v19 = vsel %vm488_vm3, %v1631_v17, -inf  ;;  %v591_v21 = vsel %vm581_vm2, %v1631_v17, -inf }
  0xcb   : > { %496 = vmax.xlane.f32.xlu0 %v495_v18  ;;  %499 = vmax.xlane.f32.xlu2 %v498_v19 }
  0xd1   : > { %v1637_v20 = vpop.f32.mrf.mxu0 }
  0xd2   : > { %v594_v22 = vsel %vm581_vm2, %v1637_v20, -inf  ;;  %v501_v23 = vsel %vm488_vm3, %v1637_v20, -inf }
  0xd3   : > { %592 = vmax.xlane.f32.xlu0 %v591_v21  ;;  %595 = vmax.xlane.f32.xlu1 %v594_v22 }
  0xd4   : > { %502 = vmax.xlane.f32.xlu2 %v501_v23 }
  0xd9   : > { %v1645_v24 = vpop.f32.mrf.mxu0 }
  0xda   : > { %v597_v25 = vsel %vm581_vm2, %v1645_v24, -inf  ;;  %v504_v26 = vsel %vm488_vm3, %v1645_v24, -inf }
  0xdb   : > { %598 = vmax.xlane.f32.xlu1 %v597_v25  ;;  %505 = vmax.xlane.f32.xlu0 %v504_v26 }
  0xe1   : > { %v1651_v27 = vpop.f32.mrf.mxu0 }
  0xe2   : > { %v600_v28 = vsel %vm581_vm2, %v1651_v27, -inf  ;;  %v507_v63 = vsel %vm488_vm3, %v1651_v27, -inf }
  0xe3   : > { %601 = vmax.xlane.f32.xlu2 %v600_v28 }
  0xe9   : > { %v1655_v29 = vpop.f32.mrf.mxu0 }
  0xea   : > { %v603_v30 = vsel %vm581_vm2, %v1655_v29, -inf  ;;  %v510_v5 = vsel %vm488_vm3, %v1655_v29, -inf }
  0xeb   : > { %604 = vmax.xlane.f32.xlu2 %v603_v30 }
 0x126   : > { %v584_v31 = vpop.xlane.xlu0 %583  ;;  %v491_v42 = vpop.xlane.xlu2 %490 }
 0x127   : > { %v606_v32 = vsub.f32 %v1617_v10, %v584_v31  ;;  %v513_v16 = vsub.f32 %v1617_v10, %v491_v42 }
 0x129   : > { %v614_v33 = vmul.f32 1.442695, %v606_v32 }
 0x12b   : > { %1269 = vpow2.f32 %v614_v33 }
 0x12e   : > { %v587_v34 = vpop.xlane.xlu1 %586 }
 0x12f   : > { %v607_v35 = vsub.f32 %v1623_v13, %v587_v34 }
 0x131   : > { %v1661_v36 = vpop.eup %1269  ;;  %v616_v37 = vmul.f32 1.442695, %v607_v35 }
 0x132   : > { %638 = vrot.lane.b32.xlu1 %v1661_v36, %s1485_s20 }
 0x133   : > { %1271 = vpow2.f32 %v616_v37 }
 0x136   : > { %v590_v38 = vpop.xlane.xlu0 %589 }
 0x137   : > { %v608_v39 = vsub.f32 %v1627_v15, %v590_v38 }
 0x139   : > { %v1666_v40 = vpop.eup %1271  ;;  %v618_v41 = vmul.f32 1.442695, %v608_v39 }
 0x13a   : > { %640 = vrot.lane.b32.xlu1 %v1666_v40, %s1485_s20 }
 0x13b   : > { %1273 = vpow2.f32 %v618_v41 }
 0x13e   : > { %v497_v43 = vpop.xlane.xlu0 %496  ;;  %v1674_v45 = vpop.xlane.xlu2 %499 }
 0x13f   : > { %v515_v6 = vsub.f32 %v1627_v15, %v497_v43  ;;  %v521_v15 = vmul.f32 1.442695, %v513_v16  ;;  %v516_v39 = vsub.f32 %v1631_v17, %v1674_v45  ;;  %v1171_v16 = vld [vmem:[%s384_s30 + $0x8] sm:$0xff] }
 0x141   : > { %v1670_v44 = vpop.eup %1273  ;;  %v525_v7 = vmul.f32 1.442695, %v515_v6  ;;  %v527_v42 = vmul.f32 1.442695, %v516_v39 }
 0x142   : > { %642 = vrot.lane.b32.xlu2 %v1670_v44, %s1485_s20 }
 0x146   : > { %v593_v46 = vpop.xlane.xlu0 %592  ;;  %v596_v47 = vpop.xlane.xlu1 %595 }
 0x147   : > { %v609_v48 = vsub.f32 %v1631_v17, %v593_v46  ;;  %v610_v49 = vsub.f32 %v1637_v20, %v596_v47  ;;  %v503_v52 = vpop.xlane.xlu2 %502 }
 0x148   : > { %v517_v8 = vsub.f32 %v1637_v20, %v503_v52 }
 0x149   : > { %v620_v50 = vmul.f32 1.442695, %v609_v48  ;;  %v622_v51 = vmul.f32 1.442695, %v610_v49 }
 0x14a   : > { %v529_v12 = vmul.f32 1.442695, %v517_v8 }
 0x14b   : > { %1275 = vpow2.f32 %v620_v50 }
 0x14c   : > { %1277 = vpow2.f32 %v622_v51 }
 0x14e   : > { %v599_v0 = vpop.xlane.xlu1 %598  ;;  %v506_v26 = vpop.xlane.xlu0 %505 }
 0x14f   : > { %v611_v1 = vsub.f32 %v1645_v24, %v599_v0  ;;  %v518_v43 = vsub.f32 %v1645_v24, %v506_v26 }
 0x151   : > { %v1678_v53 = vpop.eup %1275  ;;  %v624_v2 = vmul.f32 1.442695, %v611_v1  ;;  %v531_v48 = vmul.f32 1.442695, %v518_v43 }
 0x152   : > { %v1680_v54 = vpop.eup %1277  ;;  %644 = vrot.lane.b32.xlu0 %v1678_v53, %s1485_s20 }
 0x153   : > { %646 = vrot.lane.b32.xlu1 %v1680_v54, %s1485_s20 }
 0x156   : > { %v602_v55 = vpop.xlane.xlu2 %601 }
 0x157   : > { %v612_v56 = vsub.f32 %v1651_v27, %v602_v55 }
 0x159   : > { %v626_v57 = vmul.f32 1.442695, %v612_v56 }
 0x15b   : > { %1279 = vpow2.f32 %v626_v57 }
 0x15e   : > { %v605_v58 = vpop.xlane.xlu2 %604 }
 0x15f   : > { %v613_v59 = vsub.f32 %v1655_v29, %v605_v58 }
 0x161   : > { %v1688_v60 = vpop.eup %1279  ;;  %v628_v61 = vmul.f32 1.442695, %v613_v59 }
 0x162   : > { %650 = vrot.lane.b32.xlu1 %v1688_v60, %s1485_s20 }
 0x163   : > { %1281 = vpow2.f32 %v628_v61 }
 0x164   : > { %1283 = vpow2.f32 %v624_v2  ;;  %v1173_v2 = vld [vmem:[%s384_s30 + $0x18] sm:$0xff] }
 0x165   : > { %1285 = vpow2.f32 %v525_v7  ;;  %1179 = vmatpush.bf16.msra.mxu3 %v1173_v2  ;;  %754 = vmatpush.bf16.msra.mxu1 %v1173_v2 }
 0x166   : > { %1287 = vpow2.f32 %v529_v12 }
 0x167   : > { %1289 = vpow2.f32 %v521_v15 }
 0x168   : > { %1291 = vpow2.f32 %v527_v42 }
 0x169   : > { %v1692_v62 = vpop.eup %1281  ;;  %1293 = vpow2.f32 %v531_v48 }
 0x16a   : > { %652 = vrot.lane.b32.xlu1 %v1692_v62, %s1485_s20  ;;  %v1701_v4 = vpop.eup %1283 }
 0x16b   : > { %508 = vmax.xlane.f32.xlu2 %v507_v63  ;;  %v1710_v14 = vpop.eup %1285 }
 0x16c   : > { %v543_v19 = vsel %vm488_vm3, %v1710_v14, 0.0  ;;  %v1715_v21 = vpop.eup %1287 }
 0x16d   : > { %v549_v23 = vsel %vm488_vm3, %v1715_v21, 0.0  ;;  %v1720_v25 = vpop.eup %1289 }
 0x16e   : > { %v537_v10 = vsel %vm488_vm3, %v1720_v25, 0.0  ;;  %v1733_v49 = vpop.eup %1291 }
 0x16f   : > { %v546_v51 = vsel %vm488_vm3, %v1733_v49, 0.0  ;;  %v1738_v52 = vpop.eup %1293 }
 0x170   : > { %v552_v55 = vsel %vm488_vm3, %v1738_v52, 0.0 }
 0x17c   : > { %493 = vmax.xlane.f32.xlu0 %v492_v3 }
 0x183   : > { %648 = vrot.lane.b32.xlu2 %v1701_v4, %s1485_s20 }
 0x184   : > { %511 = vmax.xlane.f32.xlu0 %v510_v5 }
 0x19c   : > { %v643_v9 = vpop.permute.xlu2 %642 }
 0x19d   : > { %v668_v11 = vsel %vm488_vm3, %v643_v9, 0.0 }
 0x19e   : > { %669 = vadd.xlane.f32.xlu1 %v668_v11  ;;  %v1172_v11 = vld [vmem:[%s384_s30 + $0x10] sm:$0xff] }
 0x19f   : > { %1180 = vmatpush.bf16.msra.mxu3 %v1172_v11  ;;  %755 = vmatpush.bf16.msra.mxu1 %v1172_v11  ;;  %v882_v11 = vld [vmem:[#allocation5 + $0x10] sm:$0xff] }
 0x1a3   : > { %1181 = vmatpush.bf16.msra.mxu3 %v1171_v16  ;;  %756 = vmatpush.bf16.msra.mxu1 %v1171_v16 }
 0x1a4   : > { %v639_v18 = vpop.permute.xlu1 %638 }
 0x1a5   : > { %v662_v33 = vsel %vm488_vm3, %v639_v18, 0.0 }
 0x1a6   : > { %544 = vadd.xlane.f32.xlu1 %v543_v19  ;;  %v1170_v19 = vld [vmem:[%s384_s30] sm:$0xff]  ;;  %s1409_s30 = scalar_lea.hbm %s1408_s28, 64 }
 0x1a7   : > { %1182 = vmatpush.bf16.msra.mxu3 %v1170_v19  ;;  %757 = vmatpush.bf16.msra.mxu1 %v1170_v19  ;;  %p1410_p1 = scmp.ne.s32.totalorder %s1408_s28, %s1409_s30 }
 0x1a9   : > { %p1411_p2 = pnand %p1410_p1, %p1563_p4 }
 0x1ab   : > { %p1412_p3 = pneg %p1411_p2 }
 0x1ac   : > { %v641_v20 = vpop.permute.xlu1 %640 }
 0x1ad   : > { %v665_v22 = vsel %vm488_vm3, %v641_v20, 0.0 }
 0x1ae   : > { %666 = vadd.xlane.f32.xlu2 %v665_v22  ;;  %550 = vadd.xlane.f32.xlu1 %v549_v23 }
 0x1b6   : > { %538 = vadd.xlane.f32.xlu1 %v537_v10 }
 0x1c4   : > { %v645_v28 = vpop.permute.xlu0 %644 }
 0x1c5   : > { %v647_v30 = vpop.permute.xlu1 %646  ;;  %v671_v31 = vsel %vm488_vm3, %v645_v28, 0.0 }
 0x1c6   : > { %v674_v32 = vsel %vm488_vm3, %v647_v30, 0.0  ;;  %672 = vadd.xlane.f32.xlu0 %v671_v31 }
 0x1c7   : > { %675 = vadd.xlane.f32.xlu2 %v674_v32  ;;  %v1177_v32 = vld [vmem:[%s389_s14 + $0x18] sm:$0xff] }
 0x1c8   : > { %1183 = vmatpush.bf16.msra.mxu2 %v1177_v32  ;;  %839 = vmatpush.bf16.msrb.mxu1 %v1177_v32  ;;  %v864_v32 = vld [vmem:[#allocation2] sm:$0xff] }
 0x1ce   : > { %663 = vadd.xlane.f32.xlu0 %v662_v33 }
 0x1d4   : > { %v651_v34 = vpop.permute.xlu1 %650 }
 0x1d5   : > { %v680_v35 = vsel %vm488_vm3, %v651_v34, 0.0 }
 0x1d6   : > { %681 = vadd.xlane.f32.xlu2 %v680_v35 }
 0x1dc   : > { %v653_v37 = vpop.permute.xlu1 %652 }
 0x1dd   : > { %v683_v38 = vsel %vm488_vm3, %v653_v37, 0.0 }
 0x1de   : > { %684 = vadd.xlane.f32.xlu1 %v683_v38  ;;  %v509_v41 = vpop.xlane.xlu2 %508  ;;  %v1175_v38 = vld [vmem:[%s389_s14 + $0x8] sm:$0xff] }
 0x1df   : > { %v519_v24 = vsub.f32 %v1651_v27, %v509_v41 }
 0x1e1   : > { %v533_v56 = vmul.f32 1.442695, %v519_v24 }
 0x1e6   : > { %v649_v46 = vpop.permute.xlu2 %648 }
 0x1e7   : > { %v677_v47 = vsel %vm488_vm3, %v649_v46, 0.0 }
 0x1e8   : > { %678 = vadd.xlane.f32.xlu0 %v677_v47  ;;  %v1174_v47 = vld [vmem:[%s389_s14] sm:$0xff] }
 0x1ef   : > { %v494_v50 = vpop.xlane.xlu0 %493 }
 0x1f0   : > { %v514_v17 = vsub.f32 %v1623_v13, %v494_v50  ;;  %547 = vadd.xlane.f32.xlu0 %v546_v51 }
 0x1f2   : > { %v523_v45 = vmul.f32 1.442695, %v514_v17 }
 0x1f4   : > { %1295 = vpow2.f32 %v523_v45 }
 0x1f5   : > { %1297 = vpow2.f32 %v533_v56 }
 0x1f7   : > { %v512_v61 = vpop.xlane.xlu0 %511 }
 0x1f8   : > { %553 = vadd.xlane.f32.xlu0 %v552_v55  ;;  %v520_v26 = vsub.f32 %v1655_v29, %v512_v61 }
 0x1fa   : > { %v1743_v57 = vpop.eup %1295  ;;  %v535_v31 = vmul.f32 1.442695, %v520_v26 }
 0x1fb   : > { %v540_v58 = vsel %vm488_vm3, %v1743_v57, 0.0  ;;  %v1747_v13 = vpop.eup %1297 }
 0x1fc   : > { %v555_v59 = vsel %vm488_vm3, %v1747_v13, 0.0 }
 0x200   : > { %541 = vadd.xlane.f32.xlu0 %v540_v58 }
 0x208   : > { %556 = vadd.xlane.f32.xlu0 %v555_v59 }
 0x211   : > { %v670_v27 = vpop.xlane.xlu1 %669 }
 0x212   : > { %1299 = vrcp.f32 %v670_v27 }
 0x218   : > { %v1300_v3 = vpop.eup %1299 }
 0x219   : > { %v545_v63 = vpop.xlane.xlu1 %544  ;;  %v696_v7 = vmul.f32 %v1300_v3, %v1670_v44 }
 0x221   : > { %v667_v1 = vpop.xlane.xlu2 %666  ;;  %v1755_v5 = vpop.xlane.xlu1 %550 }
 0x229   : > { %v1760_v18 = vpop.xlane.xlu1 %538 }
 0x239   : > { %v673_v0 = vpop.xlane.xlu0 %672 }
 0x23a   : > { %1301 = vrcp.f32 %v673_v0  ;;  %v676_v12 = vpop.xlane.xlu2 %675 }
 0x240   : > { %v1302_v6 = vpop.eup %1301 }
 0x241   : > { %v697_v8 = vmul.f32 %v1302_v6, %v1678_v53  ;;  %v664_v53 = vpop.xlane.xlu0 %663 }
 0x243   : > { %v703_v9 = vpack.c.bf16 %v697_v8, %v696_v7 }
 0x245   : > { %793 = vrot.lane.b32.xlu2 %v703_v9, %s1485_s20  ;;  %v866_v9 = vld [vmem:[#allocation2 + $0x10] sm:$0xff] }
 0x249   : > { %v682_v15 = vpop.xlane.xlu2 %681 }
 0x24a   : > { %1303 = vrcp.f32 %v682_v15  ;;  %v867_v15 = vld [vmem:[#allocation2 + $0x18] sm:$0xff] }
 0x250   : > { %v1304_v20 = vpop.eup %1303 }
 0x251   : > { %v685_v44 = vpop.xlane.xlu1 %684  ;;  %v700_v23 = vmul.f32 %v1304_v20, %v1688_v60  ;;  %v1176_v60 = vld [vmem:[%s389_s14 + $0x10] sm:$0xff]  ;;  %s1413_s14 = scalar_lea.hbm %s1852_s6, 128 }
 0x252   : > { %1305 = vrcp.f32 %v685_v44  ;;  %1184 = vmatpush.bf16.msra.mxu2 %v1176_v60  ;;  %840 = vmatpush.bf16.msrb.mxu1 %v1176_v60  ;;  %v883_v44 = vld [vmem:[#allocation5 + $0x18] sm:$0xff]  ;;  %v880_v60 = vld [vmem:[#allocation5] sm:$0xff]  ;;  %p1415_p6 = scmp.lt.s32.totalorder %s1413_s14, %s1409_s30 }
 0x253   : > { %1307 = vrcp.f32 %v676_v12 }
 0x254   : > { %p1416_p7 = por %p1415_p6, %p1414_p5 }
 0x256   : > { %1185 = vmatpush.bf16.msra.mxu2 %v1175_v38  ;;  %841 = vmatpush.bf16.msrb.mxu1 %v1175_v38  ;;  %p1417_p9 = pnand %p1416_p7, %p1412_p3 }
 0x258   : > { %v1306_v22 = vpop.eup %1305 }
 0x259   : > { %v701_v10 = vmul.f32 %v1306_v22, %v1692_v62  ;;  %v1308_v33 = vpop.eup %1307 }
 0x25a   : > { %v698_v34 = vmul.f32 %v1308_v33, %v1680_v54  ;;  %1186 = vmatpush.bf16.msra.mxu2 %v1174_v47  ;;  %842 = vmatpush.bf16.msrb.mxu1 %v1174_v47 }
 0x25b   : > { %v679_v28 = vpop.xlane.xlu0 %678  ;;  %v705_v30 = vpack.c.bf16 %v701_v10, %v700_v23 }
 0x25c   : > { %1309 = vrcp.f32 %v679_v28 }
 0x25d   : > { %797 = vrot.lane.b32.xlu0 %v705_v30, %s1485_s20  ;;  %1311 = vrcp.f32 %v664_v53  ;;  %v868_v30 = vld [vmem:[#allocation2 + $0x20] sm:$0xff] }
 0x25e   : > { %1313 = vrcp.f32 %v545_v63 }
 0x25f   : > { %1315 = vrcp.f32 %v667_v1 }
 0x260   : > { %1317 = vpow2.f32 %v535_v31  ;;  %v884_v31 = vld [vmem:[#allocation5 + $0x20] sm:$0xff] }
 0x262   : > { %v1310_v62 = vpop.eup %1309 }
 0x263   : > { %v548_v29 = vpop.xlane.xlu0 %547  ;;  %v699_v35 = vmul.f32 %v1310_v62, %v1701_v4  ;;  %v1312_v39 = vpop.eup %1311 }
 0x264   : > { %1319 = vrcp.f32 %v548_v29  ;;  %v1314_v41 = vpop.eup %1313  ;;  %v694_v46 = vmul.f32 %v1312_v39, %v1661_v36 }
 0x265   : > { %v704_v37 = vpack.c.bf16 %v699_v35, %v698_v34  ;;  %v1316_v42 = vpop.eup %1315  ;;  %v571_v50 = vmul.f32 %v1314_v41, %v1710_v14 }
 0x266   : > { %v1318_v43 = vpop.eup %1317  ;;  %v695_v4 = vmul.f32 %v1316_v42, %v1666_v40  ;;  %v869_v42 = vld [vmem:[#allocation2 + $0x28] sm:$0xff] }
 0x267   : > { %795 = vrot.lane.b32.xlu1 %v704_v37, %s1485_s20  ;;  %v558_v17 = vsel %vm488_vm3, %v1318_v43, 0.0 }
 0x268   : > { %v702_v45 = vpack.c.bf16 %v695_v4, %v694_v46  ;;  %v865_v46 = vld [vmem:[#allocation2 + $0x8] sm:$0xff] }
 0x26a   : > { %v1320_v48 = vpop.eup %1319 }
 0x26b   : > { %v554_v54 = vpop.xlane.xlu0 %553  ;;  %v572_v51 = vmul.f32 %v1320_v48, %v1733_v49  ;;  %v881_v48 = vld [vmem:[#allocation5 + $0x8] sm:$0xff] }
 0x26c   : > { %1321 = vrcp.f32 %v554_v54 }
 0x26d   : > { %v578_v24 = vpack.c.bf16 %v572_v51, %v571_v50  ;;  %1323 = vrcp.f32 %v1755_v5 }
 0x26e   : > { %559 = vadd.xlane.f32.xlu2 %v558_v17  ;;  %1325 = vrcp.f32 %v1760_v18 }
 0x26f   : > { %791 = vrot.lane.b32.xlu1 %v702_v45, %s1485_s20  ;;  %1133 = vmatmul.msk.bf16.vlgmr.msra.gmra.mxu3 %vm488_vm3, %v578_v24  ;;  %s927_s20 = sshll.u32 %s1797_s16, 4  ;;  %s928_s20 = int_to_ptr.vmem [resolvable:$true] %s927_s20 }
 0x272   : > { %v1322_v40 = vpop.eup %1321 }
 0x273   : > { %v542_v36 = vpop.xlane.xlu0 %541  ;;  %v1324_v14 = vpop.eup %1323  ;;  %v574_v55 = vmul.f32 %v1322_v40, %v1738_v52  ;;  %v886_v40 = vld [vmem:[#allocation5 + $0x30] sm:$0xff] }
 0x274   : > { %1327 = vrcp.f32 %v542_v36  ;;  %v1326_v49 = vpop.eup %1325  ;;  %v573_v27 = vmul.f32 %v1324_v14, %v1715_v21  ;;  %v870_v14 = vld [vmem:[#allocation2 + $0x30] sm:$0xff] }
 0x275   : > { %v569_v58 = vmul.f32 %v1326_v49, %v1720_v25 }
 0x276   : > { %v579_v63 = vpack.c.bf16 %v574_v55, %v573_v27  ;;  %v887_v27 = vld [vmem:[#allocation5 + $0x38] sm:$0xff] }
 0x27a   : > { %v1328_v56 = vpop.eup %1327 }
 0x27b   : > { %v570_v59 = vmul.f32 %v1328_v56, %v1743_v57  ;;  %v557_v52 = vpop.xlane.xlu0 %556 }
 0x27c   : > { %1329 = vrcp.f32 %v557_v52 }
 0x27d   : > { %v577_v61 = vpack.c.bf16 %v570_v59, %v569_v58 }
 0x27f   : > { %1132 = vmatmul.msk.bf16.vlgmr.msra.gmra.mxu1 %vm488_vm3, %v577_v61  ;;  %1134 = vmatmul.msk.bf16.gmra.mxu3 %vm488_vm3, %v579_v63  ;;  %v871_v61 = vld [vmem:[#allocation2 + $0x38] sm:$0xff] }
 0x282   : > { %v1330_v21 = vpop.eup %1329 }
 0x283   : > { %v575_v5 = vmul.f32 %v1330_v21, %v1747_v13 }
 0x29f   : > { %v794_v0 = vpop.permute.xlu2 %793 }
 0x2a0   : > { %1153 = vmatmul.msk.bf16.vlgmr.msra.gmra.mxu2 %vm488_vm3, %v794_v0 }
 0x2cf   : > { %v798_v3 = vpop.permute.xlu0 %797 }
 0x2d9   : > { %v796_v1 = vpop.permute.xlu1 %795 }
 0x2da   : > { %1154 = vmatmul.msk.bf16.gmra.mxu2 %vm488_vm3, %v796_v1 }
 0x2e1   : > { %v560_v25 = vpop.xlane.xlu2 %559  ;;  %v792_v57 = vpop.permute.xlu1 %791 }
 0x2e2   : > { %1331 = vrcp.f32 %v560_v25  ;;  %1152 = vmatmul.msk.bf16.vlgmr.msrb.gmra.mxu1 %vm488_vm3, %v792_v57 }
 0x2e8   : > { %v1332_v2 = vpop.eup %1331 }
 0x2e9   : > { %v576_v6 = vmul.f32 %v1332_v2, %v1318_v43  ;;  %v885_v43 = vld [vmem:[#allocation5 + $0x28] sm:$0xff] }
 0x2ea   : > { %1155 = vmatmul.msk.bf16.gmra.mxu2 %vm488_vm3, %v798_v3 }
 0x2eb   : > { %v580_v7 = vpack.c.bf16 %v576_v6, %v575_v5 }
 0x2ed   : > { %1135 = vmatmul.msk.bf16.gmra.mxu3 %vm488_vm3, %v580_v7 }
 0x2f2   : > { %v764_v8 = vpop.f32.mrf.mxu3 }
 0x2f3   : > { %v874_v16 = vmul.f32 %v866_v9, %v764_v8 }
 0x2fa   : > { %v766_v13 = vpop.f32.mrf.mxu3 }
 0x2fb   : > { %v875_v20 = vmul.f32 %v867_v15, %v766_v13 }
 0x2fc   : > { %v759_v10 = vpop.f32.mrf.mxu1 }
 0x2fd   : > { %v872_v35 = vmul.f32 %v864_v32, %v759_v10 }
 0x302   : > { %v769_v28 = vpop.f32.mrf.mxu3 }
 0x303   : > { %v876_v62 = vmul.f32 %v868_v30, %v769_v28 }
 0x304   : > { %v761_v26 = vpop.f32.mrf.mxu1 }
 0x305   : > { %v873_v51 = vmul.f32 %v865_v46, %v761_v26 }
 0x30a   : > { %v771_v41 = vpop.f32.mrf.mxu3 }
 0x30b   : > { %v877_v54 = vmul.f32 %v869_v42, %v771_v41 }
 0x323   : > { %v849_v12 = vpop.f32.mrf.mxu2 }
 0x324   : > { %v890_v18 = vmul.f32 %v882_v11, %v849_v12 }
 0x326   : > { %v898_v19 = vadd.f32 %v890_v18, %v874_v16 }
 0x328   : > { %906 = vst [vmem:[%s1797_s16 + $0x10] sm:$0xff] %v898_v19 }
 0x32b   : > { %v851_v53 = vpop.f32.mrf.mxu2 }
 0x32c   : > { %v891_v22 = vmul.f32 %v883_v44, %v851_v53 }
 0x32e   : > { %v899_v23 = vadd.f32 %v891_v22, %v875_v20 }
 0x330   : > { %907 = vst [vmem:[%s1797_s16 + $0x18] sm:$0xff] %v899_v23 }
 0x35d   : > { %v854_v33 = vpop.f32.mrf.mxu2 }
 0x35e   : > { %v892_v29 = vmul.f32 %v884_v31, %v854_v33 }
 0x35f   : > { %v844_v34 = vpop.f32.mrf.mxu1 }
 0x360   : > { %v900_v37 = vadd.f32 %v892_v29, %v876_v62  ;;  %v888_v38 = vmul.f32 %v880_v60, %v844_v34 }
 0x362   : > { %908 = vst [vmem:[%s1797_s16 + $0x20] sm:$0xff] %v900_v37  ;;  %v896_v39 = vadd.f32 %v888_v38, %v872_v35 }
 0x364   : > { %904 = vst [vmem:[%s1797_s16] sm:$0xff] %v896_v39 }
 0x365   : > { %v856_v47 = vpop.f32.mrf.mxu2 }
 0x366   : > { %v893_v4 = vmul.f32 %v885_v43, %v856_v47 }
 0x367   : > { %v846_v50 = vpop.f32.mrf.mxu1 }
 0x368   : > { %v901_v17 = vadd.f32 %v893_v4, %v877_v54  ;;  %v889_v45 = vmul.f32 %v881_v48, %v846_v50 }
 0x36a   : > { %909 = vst [vmem:[%s1797_s16 + $0x28] sm:$0xff] %v901_v17  ;;  %v897_v24 = vadd.f32 %v889_v45, %v873_v51 }
 0x36c   : > { %905 = vst [vmem:[%s1797_s16 + $0x8] sm:$0xff] %v897_v24 }
 0x36d   : > { %v859_v36 = vpop.f32.mrf.mxu2 }
 0x36e   : > { %v894_v55 = vmul.f32 %v886_v40, %v859_v36 }
 0x370   : > { %v774_v49 = vpop.f32.mrf.mxu3 }
 0x371   : > { %v878_v56 = vmul.f32 %v870_v14, %v774_v49 }
 0x373   : > { %v902_v58 = vadd.f32 %v894_v55, %v878_v56 }
 0x375   : > { %910 = vst [vmem:[%s1797_s16 + $0x30] sm:$0xff] %v902_v58  ;;  %v861_v59 = vpop.f32.mrf.mxu2 }
 0x376   : > { %v895_v0 = vmul.f32 %v887_v27, %v861_v59 }
 0x378   : > { %v776_v63 = vpop.f32.mrf.mxu3 }
 0x379   : > { %v879_v1 = vmul.f32 %v871_v61, %v776_v63 }
 0x37b   : > { %v903_v52 = vadd.f32 %v895_v0, %v879_v1 }
 0x37d   : > { %911 = vst [vmem:[%s1797_s16 + $0x38] sm:$0xff] %v903_v52 }
 0x37e   : > { %1420 = shalt.err (!%p1417_p9)
}
 0x37f   : > { %s1486_s15 = smov 128   ;;  %s1487_s16 = smov 8  }
 0x380   : > { %1196 = dma.vmem_to_hbm [thread:$0]  (%p1563_p4), %s928_s20, 1024, %s930_s27, %s913_s24, %s1486_s15, %s1486_s15, %s1487_s16  }
 0x381 PF: > { %p1213_p10 = scmp.ge.s32.totalorder %s1479_s26, 2  ;;  %s944_s12 = sand.u32 1, %s1459_s21  }
 0x382   : > { %s945_s18 = scalar_lea.sflag [#allocation4], %s944_s12 }
 0x383   : > { %p1206_p11 = pnand %p1213_p10, %p1570_p8 }
 0x385   : > { %p1207_p12 = pneg %p1206_p11 }
 0x387   : > { %1454 = dma.done.wait (%p1207_p12), %s945_s18, 1024  }
 0x388   : > { %1456 = vsyncadd (%p1207_p12), %s945_s18, 4294966272  ;;  %s21_s26 = sadd.s32 1, %s1479_s26   ;;  %s1857_s21 = smov %s1463_s22 }
 0x389   : > { %p18_p13 = scmp.ge.s32.totalorder %s21_s26, 4   ;;  %s1858_s22 = smov %s1467_s23 }
 0x38a   : > { %s1859_s23 = smov %s1576_s10  ;;  %s1860_s24 = smov %s1475_s25 }
 0x38b   : > { %s1861_s25 = smov %s1863_s29  ;;  %20 = sbr.rel (!%p18_p13) target bundleno = 6 (0x6), region = 99 }
 0x390   :  { %951 = vsyncpa [#allocation3], 1 }
 0x391   :  { %953 = vsyncpa [#allocation3 + $0x1], 1 }
 0x392   :  { %954 = vsyncpa [#allocation6], 1 }
 0x393   :  { %955 = vsyncpa [#allocation4], 1 }
 0x394   :  { %957 = vsyncpa [#allocation4 + $0x1], 1 }

</bundles_post_ra>
